<compile_context>
chip_gen: v7x
topology: tpu7x:2x2x1
jax: 0.10.0
libtpu: 0.0.40
codegen_flags: <defaults>
</compile_context>

<pallas_src>
import jax
import jax.numpy as jnp
from jax import lax
from jax.experimental import pallas as pl
from jax.experimental.pallas import tpu as pltpu


def _pick_block_b(batch, max_rows):
    """Largest divisor of `batch` that fits `max_rows`, preferring multiples of 8."""
    max_rows = int(max(1, max_rows))
    if batch <= max_rows:
        return batch
    divisors = [d for d in range(1, batch) if batch % d == 0 and d <= max_rows]
    aligned = [d for d in divisors if d % 8 == 0]
    if aligned:
        return max(aligned)
    # NOTE: a non-8-aligned block_b < B can trip the (8,128) sublane rule on the output
    # tile for awkward batch sizes; pass block_b explicitly in that case.
    return max(divisors) if divisors else batch


def _make_kernel(offsets, d_pad, n_silos):
    """offsets: static cumulative feature offsets [0, D0, D0+D1, ..., d_cat]."""

    def kernel(hs_ref, m_ref, w_ref, b_ref, out_ref):
        f32 = jnp.float32
        # CLS tokens: raw hidden state at position 0, read straight off the ref.
        cls = hs_ref[:, 0, :].astype(f32)                      # [TB, Dpad]

        # Tanhshrink on the lane-packed tile (pre_poolers; dropout = identity).
        x = hs_ref[...].astype(f32)                            # [TB, S, Dpad]
        xa = x - jnp.tanh(x)

        # Per-lane silo select of the attention mask (static lane iota -> where chain).
        m = m_ref[...].astype(f32)                             # [TB, S, n_silos]
        lane3 = lax.broadcasted_iota(jnp.int32, (1, 1, d_pad), 2)
        m_lane = jnp.float32(0.0)                              # padding lanes -> 0
        for i in reversed(range(n_silos)):
            m_lane = jnp.where(lane3 < offsets[i + 1], m[:, :, i:i + 1], m_lane)

        # Masked mean per silo (each lane carries its silo's denominator).
        masked_sum = jnp.sum(xa * m_lane, axis=1)              # [TB, Dpad]
        denom = jnp.maximum(jnp.sum(m_lane, axis=1), 1e-9)     # torch.clamp(min=1e-9)
        mean = masked_sum / denom                              # exact divide

        # Fused epilogue: one MXU dot against blockdiag(Wc, Wm), one tanh, one store.
        x_cat = jnp.concatenate([cls, mean], axis=-1)          # [TB, 2*Dpad]
        y = jnp.dot(x_cat, w_ref[...], preferred_element_type=f32) + b_ref[...]
        out_ref[...] = jnp.tanh(y).astype(out_ref.dtype)

    return kernel


def anathem_multi_silo_pooler(hidden_states, attention_masks, params, *,
                              excess_cls_ids=None, block_b=None):
    """hidden_states: list of [B, S_i, D_i] (f32 or bf16; bf16 recommended — mem-bound);
    attention_masks: list of [B, S_i]; params: per-silo Linear weights/biases
    (wc{i}: [D_i, H], wm{i}: [D_i, H], bc/bm: [1, H] or [H])."""
    n_silos = len(hidden_states)
    masks = attention_masks if excess_cls_ids is None else excess_cls_ids

    B = int(hidden_states[0].shape[0])
    H = int(params["bc"].shape[-1])
    dims = [int(h.shape[-1]) for h in hidden_states]
    seqs = [int(h.shape[1]) for h in hidden_states]
    S = max(seqs)
    d_cat = sum(dims)
    d_pad = int(pl.cdiv(d_cat, 128) * 128)

    offsets = [0]
    for d in dims:
        offsets.append(offsets[-1] + d)

    hs_dtype = hidden_states[0].dtype

    # --- host-side lane packing: pad seq to S_max, concat features, pad lanes to d_pad ---
    padded_hs = []
    for h in hidden_states:
        s_i = int(h.shape[1])
        h = h.astype(hs_dtype)
        if s_i < S:
            h = jnp.pad(h, ((0, 0), (0, S - s_i), (0, 0)))
        padded_hs.append(h)
    hs_packed = jnp.concatenate(padded_hs, axis=-1)            # [B, S, d_cat]
    if d_pad > d_cat:
        hs_packed = jnp.pad(hs_packed, ((0, 0), (0, 0), (0, d_pad - d_cat)))

    m_cols = []
    for m in masks:
        s_i = int(m.shape[1])
        m = m.astype(jnp.float32)
        if s_i < S:
            m = jnp.pad(m, ((0, 0), (0, S - s_i)))             # padded positions masked out
        m_cols.append(m)
    m_packed = jnp.stack(m_cols, axis=-1)                      # [B, S, n_silos]

    # --- resident fused weights: blockdiag(Wc_pad, Wm_pad), concat bias ---
    def cat_pad(ws):
        w = jnp.concatenate([w.astype(jnp.float32) for w in ws], axis=0)   # [d_cat, H]
        if d_pad > w.shape[0]:
            w = jnp.pad(w, ((0, d_pad - w.shape[0]), (0, 0)))
        return w

    wc = cat_pad([params[f"wc{i}"] for i in range(n_silos)])
    wm = cat_pad([params[f"wm{i}"] for i in range(n_silos)])
    W = jnp.zeros((2 * d_pad, 2 * H), jnp.float32)
    W = W.at[:d_pad, :H].set(wc)
    W = W.at[d_pad:, H:].set(wm)
    bias = jnp.concatenate(
        [params["bc"].astype(jnp.float32).reshape(1, H),
         params["bm"].astype(jnp.float32).reshape(1, H)], axis=-1)          # [1, 2H]

    # --- generation-aware VMEM budget and batch-tile selection ---
    try:
        vmem_cap = int(pltpu.get_tpu_info().vmem_capacity_bytes)
    except Exception:
        vmem_cap = 64 * 1024 * 1024                      # conservative (v7x-sized) fallback
    budget = int(vmem_cap * 0.8)

    bytes_stream_row = (S * d_pad * jnp.dtype(hs_dtype).itemsize
                        + S * n_silos * 4                 # mask (f32)
                        + 2 * H * 4)                      # output (f32)
    bytes_tmp_row = 3 * S * d_pad * 4                     # f32 working temps (x/xa, m_lane, prod)
    resident = int(W.size) * 4 + int(bias.size) * 4

    if block_b is None:
        max_rows = (budget - resident) // (2 * bytes_stream_row + bytes_tmp_row)
        block_b = _pick_block_b(B, max_rows)
    assert B % block_b == 0, "batch must be divisible by block_b"
    grid = (B // block_b,)

    want = (2 * block_b * bytes_stream_row + block_b * bytes_tmp_row
            + resident + (4 << 20))                       # headroom for Mosaic scratch
    vmem_limit = int(min(int(vmem_cap * 0.9), max(want, 16 << 20)))

    in_specs = [
        pl.BlockSpec((block_b, S, d_pad), lambda b: (b, 0, 0)),
        pl.BlockSpec((block_b, S, n_silos), lambda b: (b, 0, 0)),
        pl.BlockSpec((2 * d_pad, 2 * H), lambda b: (0, 0)),    # resident weight
        pl.BlockSpec((1, 2 * H), lambda b: (0, 0)),            # resident bias
    ]
    out_specs = pl.BlockSpec((block_b, 2 * H), lambda b: (b, 0))

    kernel = _make_kernel(tuple(offsets), d_pad, n_silos)

    return pl.pallas_call(
        kernel,
        out_shape=jax.ShapeDtypeStruct((B, 2 * H), jnp.float32),
        grid=grid,
        in_specs=in_specs,
        out_specs=out_specs,
        compiler_params=pltpu.CompilerParams(
            dimension_semantics=("parallel",),
            vmem_limit_bytes=vmem_limit),
    )(hs_packed, m_packed, W, bias)


def _reference(hidden_states, attention_masks, params):
    """Pure-JAX reference of the intended PyTorch forward (f32)."""
    hs_f32 = [h.astype(jnp.float32) for h in hidden_states]
    cls_cat = jnp.concatenate([hs[:, 0, :] for hs in hs_f32], axis=1)
    means = []
    for hs, m in zip(hs_f32, attention_masks):
        x = hs - jnp.tanh(hs)
        mexp = m.astype(jnp.float32)[:, :, None]
        s = jnp.sum(x * mexp, axis=1)
        d = jnp.maximum(jnp.sum(mexp, axis=1), 1e-9)
        means.append(s / d)
    mean_cat = jnp.concatenate(means, axis=1)
    n = len(hidden_states)
    wc = jnp.concatenate([params[f"wc{i}"] for i in range(n)], axis=0)
    wm = jnp.concatenate([params[f"wm{i}"] for i in range(n)], axis=0)
    cls_out = cls_cat @ wc + params["bc"].reshape(1, -1)
    mean_out = mean_cat @ wm + params["bm"].reshape(1, -1)
    return jnp.tanh(jnp.concatenate([cls_out, mean_out], axis=1))


if __name__ == "__main__":
    # Small config implied by the module's fallback paths:
    #   hidden_size H = 32, dim_out = 2*H = 64, dims_in = [64, 32, 16], dim_in = 112
    B = 2
    H = 32
    dims_in = [64, 32, 16]
    seq_lens = [8, 8, 8]

    key = jax.random.PRNGKey(0)
    keys = jax.random.split(key, 16)

    hidden_states = [
        jax.random.normal(keys[i], (B, s, d), dtype=jnp.float32)
        for i, (s, d) in enumerate(zip(seq_lens, dims_in))
    ]
    # Masks: 1.0 for valid tokens, trailing positions masked out.
    attention_masks = []
    for i, s in enumerate(seq_lens):
        valid = 5 + i  # 5, 6, 7 valid tokens per silo
        mask = (jnp.arange(s)[None, :] < valid).astype(jnp.float32)
        attention_masks.append(jnp.broadcast_to(mask, (B, s)))

    # Deterministic parameter init (Linear(dim_in, H) split per silo; weight is [D_i, H]).
    def init_w(k, d):
        return 0.02 * jax.random.normal(k, (d, H), dtype=jnp.float32)

    params = {
        "wc0": init_w(keys[3], dims_in[0]),
        "wc1": init_w(keys[4], dims_in[1]),
        "wc2": init_w(keys[5], dims_in[2]),
        "bc": 0.01 * jax.random.normal(keys[6], (1, H), dtype=jnp.float32),
        "wm0": init_w(keys[7], dims_in[0]),
        "wm1": init_w(keys[8], dims_in[1]),
        "wm2": init_w(keys[9], dims_in[2]),
        "bm": 0.01 * jax.random.normal(keys[10], (1, H), dtype=jnp.float32),
    }

    ref = _reference(hidden_states, attention_masks, params)

    # f32 inputs: tight check (exact divide now, no approx reciprocal).
    out = anathem_multi_silo_pooler(hidden_states, attention_masks, params)
    out = jax.block_until_ready(out)
    assert out.shape == (B, 2 * H), out.shape
    assert jnp.allclose(out, ref, atol=1e-3, rtol=1e-3), "mismatch vs reference (f32)"

    # bf16 hidden_states (recommended mem-bound path): kernel upcasts internally.
    hs_bf16 = [h.astype(jnp.bfloat16) for h in hidden_states]
    out_bf16 = anathem_multi_silo_pooler(hs_bf16, attention_masks, params)
    out_bf16 = jax.block_until_ready(out_bf16)
    assert jnp.allclose(out_bf16, ref, atol=5e-2, rtol=5e-2), "mismatch vs reference (bf16)"

    # Ragged silos (different S_i): exercises the host-side seq-padding path.
    seq_lens2 = [8, 6, 10]
    hidden_states2 = [
        jax.random.normal(keys[11 + i], (B, s, d), dtype=jnp.float32)
        for i, (s, d) in enumerate(zip(seq_lens2, dims_in))
    ]
    attention_masks2 = []
    for i, s in enumerate(seq_lens2):
        valid = 4 + i
        mask = (jnp.arange(s)[None, :] < valid).astype(jnp.float32)
        attention_masks2.append(jnp.broadcast_to(mask, (B, s)))
    ref2 = _reference(hidden_states2, attention_masks2, params)
    out2 = anathem_multi_silo_pooler(hidden_states2, attention_masks2, params)
    out2 = jax.block_until_ready(out2)
    assert jnp.allclose(out2, ref2, atol=1e-3, rtol=1e-3), "mismatch vs reference (ragged)"

    # NOTE: the original __init__ stores nn.Tanhshrink/nn.Tanh; we implement the documented
    # intent (tanhshrink pre-pool activation, tanh output activation), dropout = identity.
    print("KERNEL_OK")
</pallas_src>

<mosaic_0001>
module attributes {stable_mosaic.version = 11 : i64} {
  func.func @kernel(%arg0: i32, %arg1: memref<2x8x128xf32, #tpu.memory_space<vmem>>, %arg2: memref<2x8x3xf32, #tpu.memory_space<vmem>>, %arg3: memref<256x64xf32, #tpu.memory_space<vmem>>, %arg4: memref<1x64xf32, #tpu.memory_space<vmem>>, %arg5: memref<2x64xf32, #tpu.memory_space<vmem>>) attributes {dimension_semantics = [#tpu.dimension_semantics<parallel>], iteration_bounds = array<i64: 1>, scalar_prefetch = 0 : i64, scratch_operands = 0 : i64, tpu.core_type = #tpu.core_type<tc>, window_params = [{transform_indices = @transform_0, window_bounds = array<i64: 2, 8, 128>}, {transform_indices = @transform_1, window_bounds = array<i64: 2, 8, 3>}, {pipeline_mode = #tpu.pipeline_mode<synchronous>, transform_indices = @transform_2, window_bounds = array<i64: 256, 64>}, {pipeline_mode = #tpu.pipeline_mode<synchronous>, transform_indices = @transform_3, window_bounds = array<i64: 1, 64>}, {transform_indices = @transform_4, window_bounds = array<i64: 2, 64>}]} {
    %c0 = arith.constant 0 : index
    %c0_0 = arith.constant 0 : index
    %c0_1 = arith.constant 0 : index
    %0 = vector.load %arg1[%c0, %c0_0, %c0_1] : memref<2x8x128xf32, #tpu.memory_space<vmem>>, vector<2x1x128xf32>
    %1 = vector.shape_cast %0 : vector<2x1x128xf32> to vector<2x128xf32>
    %c0_2 = arith.constant 0 : index
    %c0_3 = arith.constant 0 : index
    %c0_4 = arith.constant 0 : index
    %2 = vector.load %arg1[%c0_2, %c0_3, %c0_4] : memref<2x8x128xf32, #tpu.memory_space<vmem>>, vector<2x8x128xf32>
    %3 = math.tanh %2 : vector<2x8x128xf32>
    %4 = arith.subf %2, %3 : vector<2x8x128xf32>
    %c0_5 = arith.constant 0 : index
    %c0_6 = arith.constant 0 : index
    %c0_7 = arith.constant 0 : index
    %5 = vector.load %arg2[%c0_5, %c0_6, %c0_7] : memref<2x8x3xf32, #tpu.memory_space<vmem>>, vector<2x8x3xf32>
    %6 = tpu.iota {dimensions = array<i32: 2>} : vector<1x1x128xi32>
    %c112_i32 = arith.constant 112 : i32
    %7 = vector.broadcast %c112_i32 : i32 to vector<1x1x128xi32>
    %8 = arith.cmpi slt, %6, %7 : vector<1x1x128xi32>
    %9 = vector.extract_strided_slice %5 {offsets = [0, 0, 2], sizes = [2, 8, 1], strides = [1, 1, 1]} : vector<2x8x3xf32> to vector<2x8x1xf32>
    %cst = arith.constant 0.000000e+00 : f32
    %10 = vector.shape_cast %8 : vector<1x1x128xi1> to vector<1x1x128xi1>
    %11 = vector.broadcast %10 : vector<1x1x128xi1> to vector<2x8x128xi1>
    %12 = vector.shape_cast %9 : vector<2x8x1xf32> to vector<2x8x1xf32>
    %13 = vector.broadcast %12 : vector<2x8x1xf32> to vector<2x8x128xf32>
    %14 = vector.broadcast %cst : f32 to vector<2x8x128xf32>
    %15 = arith.select %11, %13, %14 : vector<2x8x128xi1>, vector<2x8x128xf32>
    %c96_i32 = arith.constant 96 : i32
    %16 = vector.broadcast %c96_i32 : i32 to vector<1x1x128xi32>
    %17 = arith.cmpi slt, %6, %16 : vector<1x1x128xi32>
    %18 = vector.extract_strided_slice %5 {offsets = [0, 0, 1], sizes = [2, 8, 1], strides = [1, 1, 1]} : vector<2x8x3xf32> to vector<2x8x1xf32>
    %19 = vector.shape_cast %17 : vector<1x1x128xi1> to vector<1x1x128xi1>
    %20 = vector.broadcast %19 : vector<1x1x128xi1> to vector<2x8x128xi1>
    %21 = vector.shape_cast %18 : vector<2x8x1xf32> to vector<2x8x1xf32>
    %22 = vector.broadcast %21 : vector<2x8x1xf32> to vector<2x8x128xf32>
    %23 = arith.select %20, %22, %15 : vector<2x8x128xi1>, vector<2x8x128xf32>
    %c64_i32 = arith.constant 64 : i32
    %24 = vector.broadcast %c64_i32 : i32 to vector<1x1x128xi32>
    %25 = arith.cmpi slt, %6, %24 : vector<1x1x128xi32>
    %26 = vector.extract_strided_slice %5 {offsets = [0, 0, 0], sizes = [2, 8, 1], strides = [1, 1, 1]} : vector<2x8x3xf32> to vector<2x8x1xf32>
    %27 = vector.shape_cast %25 : vector<1x1x128xi1> to vector<1x1x128xi1>
    %28 = vector.broadcast %27 : vector<1x1x128xi1> to vector<2x8x128xi1>
    %29 = vector.shape_cast %26 : vector<2x8x1xf32> to vector<2x8x1xf32>
    %30 = vector.broadcast %29 : vector<2x8x1xf32> to vector<2x8x128xf32>
    %31 = arith.select %28, %30, %23 : vector<2x8x128xi1>, vector<2x8x128xf32>
    %32 = arith.mulf %4, %31 : vector<2x8x128xf32>
    %cst_8 = arith.constant dense<0.000000e+00> : vector<2x128xf32>
    %33 = vector.multi_reduction <add>, %32, %cst_8 [1] : vector<2x8x128xf32> to vector<2x128xf32>
    %cst_9 = arith.constant dense<0.000000e+00> : vector<2x128xf32>
    %34 = vector.multi_reduction <add>, %31, %cst_9 [1] : vector<2x8x128xf32> to vector<2x128xf32>
    %cst_10 = arith.constant 9.99999971E-10 : f32
    %35 = vector.broadcast %cst_10 : f32 to vector<2x128xf32>
    %36 = arith.maximumf %34, %35 : vector<2x128xf32>
    %37 = arith.divf %33, %36 : vector<2x128xf32>
    %38 = tpu.concatenate %1, %37 in 1 : vector<2x128xf32>, vector<2x128xf32> -> vector<2x256xf32>
    %c0_11 = arith.constant 0 : index
    %c0_12 = arith.constant 0 : index
    %39 = vector.load %arg3[%c0_11, %c0_12] : memref<256x64xf32, #tpu.memory_space<vmem>>, vector<256x64xf32>
    %cst_13 = arith.constant dense<0.000000e+00> : vector<2x64xf32>
    %40 = tpu.matmul %38, %39, %cst_13 {dimension_numbers = #tpu.dot_dimension_numbers<[1], [0], [0], [1], [0, 0, 1, 1], [], []>} : vector<2x256xf32>, vector<256x64xf32>, vector<2x64xf32> -> vector<2x64xf32>
    %c0_14 = arith.constant 0 : index
    %c0_15 = arith.constant 0 : index
    %41 = vector.load %arg4[%c0_14, %c0_15] : memref<1x64xf32, #tpu.memory_space<vmem>>, vector<1x64xf32>
    %42 = vector.broadcast %41 : vector<1x64xf32> to vector<2x64xf32>
    %43 = arith.addf %40, %42 : vector<2x64xf32>
    %44 = math.tanh %43 : vector<2x64xf32>
    %c0_16 = arith.constant 0 : index
    %c0_17 = arith.constant 0 : index
    %45 = vector.load %arg5[%c0_16, %c0_17] : memref<2x64xf32, #tpu.memory_space<vmem>>, vector<2x64xf32>
    tpu.vector_store %arg5[%c0_16, %c0_17], %44 {strides = array<i32>} : memref<2x64xf32, #tpu.memory_space<vmem>>, vector<2x64xf32>,
    return
  }
  func.func @transform_0(%arg0: i32) -> (i32, i32, i32) {
    %c0_i32 = arith.constant 0 : i32
    %c0_i32_0 = arith.constant 0 : i32
    %c0_i32_1 = arith.constant 0 : i32
    return %arg0, %c0_i32, %c0_i32_0 : i32, i32, i32
  }
  func.func @transform_1(%arg0: i32) -> (i32, i32, i32) {
    %c0_i32 = arith.constant 0 : i32
    %c0_i32_0 = arith.constant 0 : i32
    %c0_i32_1 = arith.constant 0 : i32
    return %arg0, %c0_i32, %c0_i32_0 : i32, i32, i32
  }
  func.func @transform_2(%arg0: i32) -> (i32, i32) {
    %c0_i32 = arith.constant 0 : i32
    %c0_i32_0 = arith.constant 0 : i32
    %c0_i32_1 = arith.constant 0 : i32
    return %c0_i32, %c0_i32_0 : i32, i32
  }
  func.func @transform_3(%arg0: i32) -> (i32, i32) {
    %c0_i32 = arith.constant 0 : i32
    %c0_i32_0 = arith.constant 0 : i32
    %c0_i32_1 = arith.constant 0 : i32
    return %c0_i32, %c0_i32_0 : i32, i32
  }
  func.func @transform_4(%arg0: i32) -> (i32, i32) {
    %c0_i32 = arith.constant 0 : i32
    %c0_i32_0 = arith.constant 0 : i32
    return %arg0, %c0_i32 : i32, i32
  }
}

</mosaic_0001>

<bundles_post_ra>
// kernel: tpu_custom_call.1
= control target key start
LH: loop header
LB: loop body
LE: loop exit
PB: predicated region body
PF: predicated region fallthrough
CT: control target
= control target key end

     0   :  { %v349_v1 = vmov 1   ;;  %v350_v2 = vmov 2   ;;  %s507_s0 = inlined_call_operand.vmem [shape: f32[2,8,128], index: 0, kind: input, shape index: {}]   ;;  %s508_s1 = inlined_call_operand.vmem [shape: f32[2,8,3], index: 1, kind: input, shape index: {}]   ;;  %s509_s2 = inlined_call_operand.vmem [shape: f32[256,64], index: 2, kind: input, shape index: {}]   ;;  %s510_s3 = inlined_call_operand.vmem [shape: f32[1,64], index: 3, kind: input, shape index: {}]   ;;  %s511_s4 = inlined_call_operand.hbm [shape: f32[2,64], index: 4, kind: output, shape index: {}]  }
   0x1   :  { %v26_v0 = vld [vmem:[%s508_s1] sm:$0xff]  ;;  %312 = vset.pattern.permute.xlu1 %v349_v1  ;;  %311 = vset.pattern.permute.xlu0 %v350_v2 }
   0x2   :  { %9 = vsyncpa [#allocation3], 0  ;;  %49 = vperm.xlu1 %312, %v26_v0   ;;  %35 = vperm.xlu0 %311, %v26_v0   ;;  %v27_v3 = vld [vmem:[%s508_s1 + $0x8] sm:$0xff]  ;;  %v129_v4 = vld [vmem:[%s509_s2 + $0x80] sm:$0xff]  ;;  %v351_v10 = vmov 0   ;;  %v28_v55 = vlaneseq  ;;  %vm106_vm3 = vcmask 1041409  }
   0x3   :  { %v130_v5 = vld [vmem:[%s509_s2 + $0x88] sm:$0xff]  ;;  %v113_v7 = vld [vmem:[%s509_s2] sm:$0xff]  ;;  %v131_v11 = vld [vmem:[%s509_s2 + $0x90] sm:$0xff]  ;;  %s352_s11 = smov [#allocation2]   ;;  %vm223_vm4 = vcmask 517120  }
   0x4   :  { %v275_v6 = vpack.c.bf16 %v130_v5, %v129_v4  ;;  %v114_v8 = vld [vmem:[%s509_s2 + $0x8] sm:$0xff]  ;;  %v132_v12 = vld [vmem:[%s509_s2 + $0x98] sm:$0xff]  ;;  %v115_v14 = vld [vmem:[%s509_s2 + $0x10] sm:$0xff]  ;;  %v29_v56 = vand.u32 127, %v28_v55  ;;  %s231_s12 = sshll.u32 %s352_s11, 4  ;;  %s232_s12 = int_to_ptr.vmem [resolvable:$true] %s231_s12 }
   0x5   :  { %v277_v9 = vpack.c.bf16 %v114_v8, %v113_v7  ;;  %v279_v13 = vpack.c.bf16 %v132_v12, %v131_v11  ;;  %v116_v15 = vld [vmem:[%s509_s2 + $0x18] sm:$0xff]  ;;  %v133_v17 = vld [vmem:[%s509_s2 + $0xa0] sm:$0xff]  ;;  %v134_v18 = vld [vmem:[%s509_s2 + $0xa8] sm:$0xff]  ;;  %p330_p1 = scmp.lt.s32.totalorder %s232_s12, %s232_s12 }
   0x6   :  { %53 = vperm.xlu1 %312, %v27_v3   ;;  %40 = vperm.xlu0 %311, %v27_v3   ;;  %v281_v16 = vpack.c.bf16 %v116_v15, %v115_v14  ;;  %v283_v19 = vpack.c.bf16 %v134_v18, %v133_v17  ;;  %v117_v20 = vld [vmem:[%s509_s2 + $0x20] sm:$0xff]  ;;  %v118_v21 = vld [vmem:[%s509_s2 + $0x28] sm:$0xff]  ;;  %v135_v23 = vld [vmem:[%s509_s2 + $0xb0] sm:$0xff]  ;;  %vm30_vm0 = vcmp.lt.s32.totalorder %v29_v56, 112  ;;  %vm45_vm1 = vcmp.lt.s32.totalorder %v29_v56, 96 }
   0x7   :  { %276 = vmatprep.subr.bf16.mxu0 %v275_v6  ;;  %v285_v22 = vpack.c.bf16 %v118_v21, %v117_v20  ;;  %v136_v24 = vld [vmem:[%s509_s2 + $0xb8] sm:$0xff]  ;;  %v119_v26 = vld [vmem:[%s509_s2 + $0x30] sm:$0xff]  ;;  %v137_v29 = vld [vmem:[%s509_s2 + $0xc0] sm:$0xff]  ;;  %vm58_vm2 = vcmp.lt.s32.totalorder %v29_v56, 64 }
   0x8   :  { %278 = vmatpush3.bf16.msra.mxu0 %v277_v9  ;;  %v287_v25 = vpack.c.bf16 %v136_v24, %v135_v23  ;;  %v120_v27 = vld [vmem:[%s509_s2 + $0x38] sm:$0xff]  ;;  %v138_v30 = vld [vmem:[%s509_s2 + $0xc8] sm:$0xff]  ;;  %v121_v32 = vld [vmem:[%s509_s2 + $0x40] sm:$0xff] }
   0x9   :  { %280 = vmatprep.subr.bf16.mxu0 %v279_v13  ;;  %v289_v28 = vpack.c.bf16 %v120_v27, %v119_v26  ;;  %v291_v31 = vpack.c.bf16 %v138_v30, %v137_v29  ;;  %v122_v33 = vld [vmem:[%s509_s2 + $0x48] sm:$0xff]  ;;  %v139_v35 = vld [vmem:[%s509_s2 + $0xd0] sm:$0xff]  ;;  %v140_v36 = vld [vmem:[%s509_s2 + $0xd8] sm:$0xff] }
   0xa   :  { %314 = vset.pattern.permute.xlu1 %v351_v10  ;;  %313 = vset.pattern.permute.xlu0 %v351_v10  ;;  %v293_v34 = vpack.c.bf16 %v122_v33, %v121_v32  ;;  %v123_v37 = vld [vmem:[%s509_s2 + $0x50] sm:$0xff]  ;;  %v295_v38 = vpack.c.bf16 %v140_v36, %v139_v35  ;;  %v124_v39 = vld [vmem:[%s509_s2 + $0x58] sm:$0xff]  ;;  %v141_v40 = vld [vmem:[%s509_s2 + $0xe0] sm:$0xff] }
   0xb   :  { %66 = vperm.xlu1 %314, %v27_v3   ;;  %62 = vperm.xlu0 %313, %v26_v0   ;;  %v142_v41 = vld [vmem:[%s509_s2 + $0xe8] sm:$0xff]  ;;  %v297_v42 = vpack.c.bf16 %v124_v39, %v123_v37  ;;  %v125_v44 = vld [vmem:[%s509_s2 + $0x60] sm:$0xff]  ;;  %v143_v46 = vld [vmem:[%s509_s2 + $0xf0] sm:$0xff] }
   0xc   :  { %282 = vmatpush3.bf16.msra.mxu0 %v281_v16  ;;  %v299_v43 = vpack.c.bf16 %v142_v41, %v141_v40  ;;  %v126_v45 = vld [vmem:[%s509_s2 + $0x68] sm:$0xff]  ;;  %v144_v47 = vld [vmem:[%s509_s2 + $0xf8] sm:$0xff]  ;;  %v127_v50 = vld [vmem:[%s509_s2 + $0x70] sm:$0xff] }
   0xd   :  { %284 = vmatprep.subr.bf16.mxu0 %v283_v19  ;;  %v301_v48 = vpack.c.bf16 %v126_v45, %v125_v44  ;;  %v303_v49 = vpack.c.bf16 %v144_v47, %v143_v46  ;;  %v128_v51 = vld [vmem:[%s509_s2 + $0x78] sm:$0xff]  ;;  %v21_v53 = vld [vmem:[%s507_s0 + $0x8] sm:$0xff]  ;;  %v20_v54 = vld [vmem:[%s507_s0] sm:$0xff] }
   0xe   :  { %v305_v52 = vpack.c.bf16 %v128_v51, %v127_v50  ;;  %315 = vtanh.f32 %v21_v53  ;;  %v19_v35 = vld [vmem:[%s507_s0 + $0x8] sm:$0x1]  ;;  %v18_v40 = vld [vmem:[%s507_s0] sm:$0x1]  ;;  %s325_s0 = scalar_lea.vmem %s232_s12, 32 }
   0xf   :  { %317 = vtanh.f32 %v20_v54  ;;  %v105_v37 = vrot.slane %v19_v35, 7  ;;  %v239_v47 = vld [vmem:[%s510_s3] ss:$0 sm:$0xff]  ;;  %p326_p0 = scmp.ne.s32.totalorder %s232_s12, %s325_s0  ;;  %p331_p2 = scmp.lt.s32.totalorder %s325_s0, %s325_s0 }
  0x10   :  { %286 = vmatpush3.bf16.msra.mxu0 %v285_v22 }
  0x11   :  { %288 = vmatprep.subr.bf16.mxu0 %v287_v25  ;;  %v107_v44 = vsel %vm106_vm3, %v105_v37, %v18_v40  ;;  %p332_p3 = por %p331_p2, %p330_p1 }
  0x13   :  { %p333_p4 = pnand %p332_p3, %p326_p0 }
  0x14   :  { %290 = vmatpush3.bf16.msra.mxu0 %v289_v28 }
  0x15   :  { %292 = vmatprep.subr.bf16.mxu0 %v291_v31 }
  0x18   :  { %294 = vmatpush3.bf16.msra.mxu0 %v293_v34  ;;  %v316_v59 = vpop.eup %315 }
  0x19   :  { %296 = vmatprep.subr.bf16.mxu0 %v295_v38  ;;  %v318_v60 = vpop.eup %317  ;;  %v25_v1 = vsub.f32 %v21_v53, %v316_v59 }
  0x1a   :  { %v24_v2 = vsub.f32 %v20_v54, %v318_v60 }
  0x1c   :  { %298 = vmatpush3.bf16.msra.mxu0 %v297_v42 }
  0x1d   :  { %300 = vmatprep.subr.bf16.mxu0 %v299_v43 }
  0x20   :  { %302 = vmatpush3.bf16.msra.mxu0 %v301_v48 }
  0x21   :  { %304 = vmatprep.subr.bf16.mxu0 %v303_v49 }
  0x24   :  { %306 = vmatpush3.bf16.msra.mxu0 %v305_v52 }
  0x81   :  { %v50_v57 = vpop.permute.xlu1 %49  ;;  %v36_v58 = vpop.permute.xlu0 %35 }
  0x82   :  { %v43_v63 = vsel %vm30_vm0, %v36_v58, 0.0 }
  0x83   :  { %v56_v3 = vsel %vm45_vm1, %v50_v57, %v43_v63 }
  0x85   :  { %v54_v61 = vpop.permute.xlu1 %53  ;;  %v41_v62 = vpop.permute.xlu0 %40 }
  0x86   :  { %v44_v0 = vsel %vm30_vm0, %v41_v62, 0.0 }
  0x87   :  { %v57_v4 = vsel %vm45_vm1, %v54_v61, %v44_v0 }
  0x8a   :  { %v67_v5 = vpop.permute.xlu1 %66  ;;  %v63_v6 = vpop.permute.xlu0 %62 }
  0x8b   :  { %v70_v7 = vsel %vm58_vm2, %v67_v5, %v57_v4  ;;  %v69_v8 = vsel %vm58_vm2, %v63_v6, %v56_v3 }
  0x8c   :  { %v72_v9 = vmul.f32 %v70_v7, %v25_v1  ;;  %v91_v10 = vrot.slane %v70_v7, 4  ;;  %v71_v11 = vmul.f32 %v69_v8, %v24_v2  ;;  %v85_v12 = vrot.slane %v69_v8, 4 }
  0x8e   :  { %v92_v13 = vadd.f32 %v91_v10, %v70_v7  ;;  %v86_v14 = vadd.f32 %v85_v12, %v69_v8  ;;  %v79_v15 = vrot.slane %v72_v9, 4  ;;  %v73_v17 = vrot.slane %v71_v11, 4 }
  0x90   :  { %v93_v16 = vrot.slane %v92_v13, 2  ;;  %v87_v18 = vrot.slane %v86_v14, 2  ;;  %v80_v21 = vadd.f32 %v79_v15, %v72_v9  ;;  %v74_v23 = vadd.f32 %v73_v17, %v71_v11 }
  0x92   :  { %v94_v19 = vadd.f32 %v93_v16, %v92_v13  ;;  %v88_v20 = vadd.f32 %v87_v18, %v86_v14  ;;  %v81_v27 = vrot.slane %v80_v21, 2  ;;  %v75_v29 = vrot.slane %v74_v23, 2 }
  0x94   :  { %v95_v22 = vrot.slane %v94_v19, 1  ;;  %v89_v24 = vrot.slane %v88_v20, 1  ;;  %v82_v31 = vadd.f32 %v81_v27, %v80_v21  ;;  %v76_v32 = vadd.f32 %v75_v29, %v74_v23 }
  0x96   :  { %v96_v25 = vadd.f32 %v95_v22, %v94_v19  ;;  %v90_v26 = vadd.f32 %v89_v24, %v88_v20  ;;  %v83_v33 = vrot.slane %v82_v31, 1  ;;  %v77_v34 = vrot.slane %v76_v32, 1 }
  0x98   :  { %v98_v28 = vmax.f32 %v96_v25, 1e-09  ;;  %v97_v30 = vmax.f32 %v90_v26, 1e-09  ;;  %v84_v36 = vadd.f32 %v83_v33, %v82_v31  ;;  %v78_v39 = vadd.f32 %v77_v34, %v76_v32 }
  0x9a   :  { %319 = vrcp.f32 %v98_v28 }
  0x9b   :  { %321 = vrcp.f32 %v97_v30 }
  0xa4   :  { %v320_v38 = vpop.eup %319 }
  0xa5   :  { %v322_v41 = vpop.eup %321  ;;  %v102_v42 = vmul.f32 %v320_v38, %v84_v36 }
  0xa6   :  { %v100_v43 = vmul.f32 %v322_v41, %v78_v39 }
  0xa8   :  { %v111_v45 = vsel %vm106_vm3, %v102_v42, %v100_v43 }
  0xa9   :  { %216 = vmatprep.mubr.f32.mxu0 %v111_v45 }
  0xaa   :  { %217 = vmatmul.mubr.f32.vlgmr.msra.gmra.mrb[0].mxu0 %v107_v44 }
 0x17d   :  { %v272_v46 = vpop.f32.mrb[0].mxu0 }
 0x17e   :  { %v273_v48 = vpop.f32.mrb[1].mxu0 }
 0x17f   :  { %v274_v49 = vadd.f32 %v273_v48, %v272_v46 }
 0x181   :  { %v219_v50 = vadd.f32 %v274_v49, %v239_v47 }
 0x183   :  { %323 = vtanh.f32 %v219_v50 }
 0x18d   :  { %v324_v51 = vpop.eup %323 }
 0x18e   :  { %224 = vst.msk [vmem:[#allocation2] sm:$0x3] %vm223_vm4, %v324_v51 }
 0x18f   :  { %336 = shalt.err (!%p333_p4)
}
 0x190   :  { %s337_s3 = scalar_lea.hbm %s511_s4, 32 }
 0x191   :  { %p338_p5 = scmp.ne.s32.totalorder %s511_s4, %s337_s3  ;;  %p341_p6 = scmp.lt.u32.totalorder %s337_s3, %s511_s4 }
 0x193   :  { %p343_p7 = pnand %p341_p6, %p338_p5 }
 0x195   :  { %346 = shalt.err (!%p343_p7)
}
 0x196   :  { %234 = dma.vmem_to_hbm [thread:$0]  %s232_s12, 32, %s511_s4, [#allocation3]  }
 0x197   :  { %347 = dma.done.wait [#allocation3], 32  }
 0x198   :  { %348 = vsyncadd [#allocation3], 4294967264 }
 0x199   :  { %238 = vsyncpa [#allocation3], 1 }

</bundles_post_ra>
